<compile_context>
chip_gen: v7x
topology: tpu7x:2x2x1
jax: 0.10.0
libtpu: 0.0.40
codegen_flags: <defaults>
</compile_context>

<pallas_src>
import jax
import jax.numpy as jnp
from jax.experimental import pallas as pl
from jax.experimental.pallas import tpu as pltpu


# ----------------------------- Pallas kernels ------------------------------ #
def gcn_conv_kernel(x_ref, a_ref, p_ref,
                    w1_ref, b1_ref, w2_ref, b2_ref, w3_ref, b3_ref,
                    hg_ref):
    """One grid step == one super-block of B graphs (block-diagonal A_hat)."""
    x = x_ref[...]                    # [SUPER_N, F_PAD]   bf16
    a = a_ref[...]                    # [SUPER_N, SUPER_N] bf16  D^-1/2 (A+I) D^-1/2

    # conv1: A_hat @ (X W1) + b1, ReLU
    h = jnp.dot(x, w1_ref[...], preferred_element_type=jnp.float32)
    h = jnp.dot(a, h.astype(jnp.bfloat16),
                preferred_element_type=jnp.float32) + b1_ref[...]
    h = jnp.maximum(h, 0.0)

    # conv2: A_hat @ (H W2) + b2, ReLU
    h = jnp.dot(h.astype(jnp.bfloat16), w2_ref[...],
                preferred_element_type=jnp.float32)
    h = jnp.dot(a, h.astype(jnp.bfloat16),
                preferred_element_type=jnp.float32) + b2_ref[...]
    h = jnp.maximum(h, 0.0)

    # conv3: A_hat @ (H W3) + b3   (no ReLU after conv3 in the reference)
    h = jnp.dot(h.astype(jnp.bfloat16), w3_ref[...],
                preferred_element_type=jnp.float32)
    h = jnp.dot(a, h.astype(jnp.bfloat16),
                preferred_element_type=jnp.float32) + b3_ref[...]

    # global_mean_pool: one 1/n_g row per graph (zeros on other graphs' slots).
    hg_ref[...] = jnp.dot(p_ref[...], h, preferred_element_type=jnp.float32)


def gcn_head_kernel(hg_ref, wl_ref, bl_ref, out_ref):
    """Batched Linear head + log_softmax over all pooled graph embeddings."""
    # F.dropout(p=0.5): identity at inference time.
    # TODO(synk): training-mode dropout would use pltpu.prng_seed/prng_random_bits.
    logits = jnp.dot(hg_ref[...], wl_ref[...],
                     preferred_element_type=jnp.float32) + bl_ref[...]
    m = jnp.max(logits, axis=1, keepdims=True)
    lse = m + jnp.log(jnp.sum(jnp.exp(logits - m), axis=1, keepdims=True))
    out_ref[...] = logits - lse


# ------------------------------- wrappers ----------------------------------- #
def gcn_forward(x_sb, a_sb, p_sb, params, *, graphs_per_block):
    """x_sb [NB*SUPER_N, F_PAD] bf16, a_sb [NB*SUPER_N, SUPER_N] bf16,
    p_sb [NB*B, SUPER_N] f32.  Returns log-probs [G, C] f32."""
    w1, b1, w2, b2, w3, b3, wl, bl = params
    total_rows, f_pad = x_sb.shape
    super_n = a_sb.shape[1]
    nb = total_rows // super_n
    bg = graphs_per_block
    num_graphs = nb * bg
    dim_h = w1.shape[1]
    n_classes = wl.shape[1]

    flops = nb * (2 * super_n * f_pad * dim_h          # X @ W1
                  + 2 * 2 * super_n * dim_h * dim_h    # H @ W2, H @ W3
                  + 3 * 2 * super_n * super_n * dim_h  # A_hat @ H (x3)
                  + 2 * bg * super_n * dim_h)          # mean-pool rows
    bytes_accessed = (int(x_sb.size) * 2 + int(a_sb.size) * 2
                      + int(p_sb.size) * 4
                      + sum(int(p.size) * p.dtype.itemsize for p in params)
                      + num_graphs * dim_h * 4)
    conv_cost = pl.CostEstimate(flops=int(flops), transcendentals=0,
                                bytes_accessed=int(bytes_accessed))

    conv_grid = pltpu.PrefetchScalarGridSpec(
        num_scalar_prefetch=0,
        grid=(nb,),
        in_specs=[
            pl.BlockSpec((super_n, f_pad), lambda g: (g, 0)),    # X super-block (bf16)
            pl.BlockSpec((super_n, super_n), lambda g: (g, 0)),  # A_hat super-block (bf16)
            pl.BlockSpec((bg, super_n), lambda g: (g, 0)),       # mean-pool rows
            pl.BlockSpec(w1.shape, lambda g: (0, 0)),
            pl.BlockSpec(b1.shape, lambda g: (0, 0)),
            pl.BlockSpec(w2.shape, lambda g: (0, 0)),
            pl.BlockSpec(b2.shape, lambda g: (0, 0)),
            pl.BlockSpec(w3.shape, lambda g: (0, 0)),
            pl.BlockSpec(b3.shape, lambda g: (0, 0)),
        ],
        out_specs=pl.BlockSpec((bg, dim_h), lambda g: (g, 0)),
    )
    hg = pl.pallas_call(
        gcn_conv_kernel,
        out_shape=jax.ShapeDtypeStruct((num_graphs, dim_h), jnp.float32),
        grid_spec=conv_grid,
        compiler_params=pltpu.CompilerParams(
            dimension_semantics=("parallel",),      # super-blocks across TCs (v7x)
            vmem_limit_bytes=32 * 1024 * 1024,      # safe on v5e/v6e/v7x; raise on
        ),                                          # v5e/v6e only if MAX_N grows
        cost_estimate=conv_cost,
    )(x_sb, a_sb, p_sb, w1, b1, w2, b2, w3, b3)

    head_cost = pl.CostEstimate(
        flops=int(2 * num_graphs * dim_h * n_classes),
        transcendentals=int(num_graphs * (n_classes + 1)),
        bytes_accessed=int(hg.size * 4 + wl.size * 4 + bl.size * 4
                           + num_graphs * n_classes * 4))
    head_grid = pltpu.PrefetchScalarGridSpec(
        num_scalar_prefetch=0,
        grid=(1,),
        in_specs=[
            pl.BlockSpec((num_graphs, dim_h), lambda i: (0, 0)),
            pl.BlockSpec(wl.shape, lambda i: (0, 0)),
            pl.BlockSpec(bl.shape, lambda i: (0, 0)),
        ],
        out_specs=pl.BlockSpec((num_graphs, n_classes), lambda i: (0, 0)),
    )
    out = pl.pallas_call(
        gcn_head_kernel,
        out_shape=jax.ShapeDtypeStruct((num_graphs, n_classes), jnp.float32),
        grid_spec=head_grid,
        compiler_params=pltpu.CompilerParams(
            dimension_semantics=("arbitrary",),
            vmem_limit_bytes=32 * 1024 * 1024,
        ),
        cost_estimate=head_cost,
    )(hg, wl, bl)
    return out


# ------------------------------ JAX glue ---------------------------------- #
def build_super_blocks(x, edge_index, batch, num_graphs, max_n, f_pad,
                       graphs_per_block):
    """Pack per-graph padded blocks into super-blocks of B graphs each.
    Returns X [NB*SUPER_N, F_PAD] bf16, block-diagonal A_hat [NB*SUPER_N, SUPER_N]
    bf16, mean-pool rows [NB*B, SUPER_N] f32.  Assumes nodes sorted by graph id
    and intra-graph edges only (asserted)."""
    n, f_in = x.shape
    gids = jnp.arange(num_graphs, dtype=jnp.int32)
    counts = jnp.sum(batch[None, :] == gids[:, None], axis=1).astype(jnp.int32)
    assert int(jnp.max(counts)) <= max_n, "graph node count exceeds max_n"
    assert num_graphs % graphs_per_block == 0, "num_graphs must divide evenly"
    offsets = jnp.concatenate([jnp.zeros((1,), jnp.int32),
                               jnp.cumsum(counts)[:-1].astype(jnp.int32)])
    local = jnp.arange(n, dtype=jnp.int32) - offsets[batch]

    # Node features, zero-padded per graph to [G, max_n, f_pad].
    x_feat = jnp.pad(x.astype(jnp.float32), ((0, 0), (0, f_pad - f_in)))
    x_g = jnp.zeros((num_graphs, max_n, f_pad), jnp.float32)
    x_g = x_g.at[batch, local].set(x_feat)

    # Dense per-graph adjacency (undirected), exactly one self loop per valid
    # node (explicit self-edges dropped first), then symmetric normalization.
    src, dst = edge_index
    assert bool(jnp.all(batch[src] == batch[dst])), "cross-graph edge found"
    g_e = batch[src]
    lsrc = src - offsets[g_e]
    ldst = dst - offsets[g_e]
    A = jnp.zeros((num_graphs, max_n, max_n), jnp.float32)
    A = A.at[g_e, lsrc, ldst].set(1.0)
    A = A.at[g_e, ldst, lsrc].set(1.0)
    eye_n = jnp.eye(max_n, dtype=jnp.float32)[None]
    valid = (jnp.arange(max_n)[None, :] < counts[:, None]).astype(jnp.float32)
    A = A * (1.0 - eye_n) + eye_n * valid[:, :, None]
    deg = A.sum(axis=2)
    dinv = jnp.where(deg > 0, 1.0 / jnp.sqrt(deg), 0.0)
    A_hat = A * dinv[:, :, None] * dinv[:, None, :]

    # Mean-pool rows: 1/n_g on valid node slots, 0 on padding.
    pool_g = valid / jnp.maximum(counts[:, None].astype(jnp.float32), 1.0)

    # Pack B consecutive graphs into each super-block.
    bg = graphs_per_block
    nb = num_graphs // bg
    super_n = bg * max_n
    eye_b = jnp.eye(bg, dtype=jnp.float32)

    x_sb = x_g.reshape(nb, super_n, f_pad).reshape(nb * super_n, f_pad)

    A4 = A_hat.reshape(nb, bg, max_n, max_n)
    A_sb = A4[:, :, :, None, :] * eye_b[None, :, None, :, None]   # block-diagonal
    A_sb = A_sb.reshape(nb, super_n, super_n).reshape(nb * super_n, super_n)

    P4 = pool_g.reshape(nb, bg, max_n)
    P_sb = (P4[:, :, None, :] * eye_b[None, :, :, None]).reshape(nb, bg, super_n)
    P_sb = P_sb.reshape(nb * bg, super_n)

    return (x_sb.astype(jnp.bfloat16),
            A_sb.astype(jnp.bfloat16),
            P_sb.astype(jnp.float32))


def glorot(key, shape):
    fan_in, fan_out = shape
    lim = (6.0 / (fan_in + fan_out)) ** 0.5
    return jax.random.uniform(key, shape, jnp.float32, -lim, lim)


# ------------------------------ reference ---------------------------------- #
def gcn_reference(x_sb, a_sb, p_sb, params, *, graphs_per_block):
    """Pure-JAX mirror of the kernel math (same bf16 operands, f32 accumulation)."""
    w1, b1, w2, b2, w3, b3, wl, bl = params
    super_n = a_sb.shape[1]
    nb = x_sb.shape[0] // super_n
    bg = graphs_per_block
    hgs = []
    for blk in range(nb):
        x = x_sb[blk * super_n:(blk + 1) * super_n]
        a = a_sb[blk * super_n:(blk + 1) * super_n]
        p = p_sb[blk * bg:(blk + 1) * bg]
        h = jnp.dot(x, w1, preferred_element_type=jnp.float32)
        h = jnp.maximum(jnp.dot(a, h.astype(jnp.bfloat16),
                                preferred_element_type=jnp.float32) + b1, 0.0)
        h = jnp.dot(h.astype(jnp.bfloat16), w2, preferred_element_type=jnp.float32)
        h = jnp.maximum(jnp.dot(a, h.astype(jnp.bfloat16),
                                preferred_element_type=jnp.float32) + b2, 0.0)
        h = jnp.dot(h.astype(jnp.bfloat16), w3, preferred_element_type=jnp.float32)
        h = jnp.dot(a, h.astype(jnp.bfloat16),
                    preferred_element_type=jnp.float32) + b3
        hgs.append(jnp.dot(p, h, preferred_element_type=jnp.float32))
    hg = jnp.concatenate(hgs, axis=0)
    logits = jnp.dot(hg, wl, preferred_element_type=jnp.float32) + bl
    m = jnp.max(logits, axis=1, keepdims=True)
    lse = m + jnp.log(jnp.sum(jnp.exp(logits - m), axis=1, keepdims=True))
    return logits - lse


if __name__ == "__main__":
    key = jax.random.PRNGKey(0)

    # PROTEINS-like toy batch: 3 node features, 2 classes, dim_h = 32.
    N_GRAPHS = 16
    MAX_N = 16                 # per-graph padded node count (sublane-aligned)
    GRAPHS_PER_BLOCK = 8       # B graphs packed per super-block
    SUPER_N = GRAPHS_PER_BLOCK * MAX_N   # = 128 -> MXU-shaped A@H on all gens
    F_IN = 3
    F_PAD = 8                  # pad 3 -> 8 so matmul operands are aligned
    DIM_H = 32
    N_CLASSES = 2

    # Deterministic varied graph sizes in [8, 16].
    node_counts = [8 + ((5 * g) % 9) for g in range(N_GRAPHS)]
    offsets_py, tot = [], 0
    for c in node_counts:
        offsets_py.append(tot)
        tot += c
    N_NODES = tot

    k_x, k_e, k1, k2, k3, k4, kb = jax.random.split(key, 7)
    x = jax.random.normal(k_x, (N_NODES, F_IN), jnp.float32)
    batch = jnp.concatenate(
        [jnp.full((c,), g, jnp.int32) for g, c in enumerate(node_counts)])

    # Random intra-graph edges (A_hat must be block-diagonal per graph).
    edge_chunks = []
    for g, c in enumerate(node_counts):
        kg = jax.random.fold_in(k_e, g)
        e = jax.random.randint(kg, (2, 2 * c), 0, c, dtype=jnp.int32) + offsets_py[g]
        edge_chunks.append(e)
    edge_index = jnp.concatenate(edge_chunks, axis=1)

    x_sb, a_sb, p_sb = build_super_blocks(x, edge_index, batch, N_GRAPHS,
                                          MAX_N, F_PAD, GRAPHS_PER_BLOCK)

    # GCNConv weights in bf16 (MXU-native), biases and head in f32.
    params = (
        jnp.pad(glorot(k1, (F_IN, DIM_H)),
                ((0, F_PAD - F_IN), (0, 0))).astype(jnp.bfloat16),
        jnp.zeros((1, DIM_H), jnp.float32),
        glorot(k2, (DIM_H, DIM_H)).astype(jnp.bfloat16),
        jnp.zeros((1, DIM_H), jnp.float32),
        glorot(k3, (DIM_H, DIM_H)).astype(jnp.bfloat16),
        jnp.zeros((1, DIM_H), jnp.float32),
        glorot(k4, (DIM_H, N_CLASSES)),
        jax.random.uniform(kb, (1, N_CLASSES), jnp.float32, -0.1, 0.1),
    )

    out = gcn_forward(x_sb, a_sb, p_sb, params,
                      graphs_per_block=GRAPHS_PER_BLOCK)
    out = jax.block_until_ready(out)

    ref = gcn_reference(x_sb, a_sb, p_sb, params,
                        graphs_per_block=GRAPHS_PER_BLOCK)
    assert out.shape == (N_GRAPHS, N_CLASSES)
    assert jnp.allclose(out, ref, atol=1e-2, rtol=1e-2), (out, ref)

    print("KERNEL_OK")
</pallas_src>

<mosaic_0001>
module attributes {stable_mosaic.version = 11 : i64} {
  func.func @gcn_conv_kernel(%arg0: i32, %arg1: memref<128x8xbf16, #tpu.memory_space<vmem>>, %arg2: memref<128x128xbf16, #tpu.memory_space<vmem>>, %arg3: memref<8x128xf32, #tpu.memory_space<vmem>>, %arg4: memref<8x32xbf16, #tpu.memory_space<vmem>>, %arg5: memref<1x32xf32, #tpu.memory_space<vmem>>, %arg6: memref<32x32xbf16, #tpu.memory_space<vmem>>, %arg7: memref<1x32xf32, #tpu.memory_space<vmem>>, %arg8: memref<32x32xbf16, #tpu.memory_space<vmem>>, %arg9: memref<1x32xf32, #tpu.memory_space<vmem>>, %arg10: memref<8x32xf32, #tpu.memory_space<vmem>>) attributes {dimension_semantics = [#tpu.dimension_semantics<parallel>], iteration_bounds = array<i64: 2>, scalar_prefetch = 0 : i64, scratch_operands = 0 : i64, tpu.core_type = #tpu.core_type<tc>, window_params = [{transform_indices = @transform_0, window_bounds = array<i64: 128, 8>}, {transform_indices = @transform_1, window_bounds = array<i64: 128, 128>}, {transform_indices = @transform_2, window_bounds = array<i64: 8, 128>}, {pipeline_mode = #tpu.pipeline_mode<synchronous>, transform_indices = @transform_3, window_bounds = array<i64: 8, 32>}, {pipeline_mode = #tpu.pipeline_mode<synchronous>, transform_indices = @transform_4, window_bounds = array<i64: 1, 32>}, {pipeline_mode = #tpu.pipeline_mode<synchronous>, transform_indices = @transform_5, window_bounds = array<i64: 32, 32>}, {pipeline_mode = #tpu.pipeline_mode<synchronous>, transform_indices = @transform_6, window_bounds = array<i64: 1, 32>}, {pipeline_mode = #tpu.pipeline_mode<synchronous>, transform_indices = @transform_7, window_bounds = array<i64: 32, 32>}, {pipeline_mode = #tpu.pipeline_mode<synchronous>, transform_indices = @transform_8, window_bounds = array<i64: 1, 32>}, {transform_indices = @transform_9, window_bounds = array<i64: 8, 32>}]} {
    %c0 = arith.constant 0 : index
    %c0_0 = arith.constant 0 : index
    %0 = vector.load %arg1[%c0, %c0_0] : memref<128x8xbf16, #tpu.memory_space<vmem>>, vector<128x8xbf16>
    %c0_1 = arith.constant 0 : index
    %c0_2 = arith.constant 0 : index
    %1 = vector.load %arg2[%c0_1, %c0_2] : memref<128x128xbf16, #tpu.memory_space<vmem>>, vector<128x128xbf16>
    %c0_3 = arith.constant 0 : index
    %c0_4 = arith.constant 0 : index
    %2 = vector.load %arg4[%c0_3, %c0_4] : memref<8x32xbf16, #tpu.memory_space<vmem>>, vector<8x32xbf16>
    %cst = arith.constant dense<0.000000e+00> : vector<128x32xf32>
    %3 = tpu.matmul %0, %2, %cst {dimension_numbers = #tpu.dot_dimension_numbers<[1], [0], [0], [1], [0, 0, 1, 1], [], []>} : vector<128x8xbf16>, vector<8x32xbf16>, vector<128x32xf32> -> vector<128x32xf32>
    %4 = arith.truncf %3 : vector<128x32xf32> to vector<128x32xbf16>
    %cst_5 = arith.constant dense<0.000000e+00> : vector<128x32xf32>
    %5 = tpu.matmul %1, %4, %cst_5 {dimension_numbers = #tpu.dot_dimension_numbers<[1], [0], [0], [1], [0, 0, 1, 1], [], []>} : vector<128x128xbf16>, vector<128x32xbf16>, vector<128x32xf32> -> vector<128x32xf32>
    %c0_6 = arith.constant 0 : index
    %c0_7 = arith.constant 0 : index
    %6 = vector.load %arg5[%c0_6, %c0_7] : memref<1x32xf32, #tpu.memory_space<vmem>>, vector<1x32xf32>
    %7 = vector.broadcast %6 : vector<1x32xf32> to vector<128x32xf32>
    %8 = arith.addf %5, %7 : vector<128x32xf32>
    %cst_8 = arith.constant 0.000000e+00 : f32
    %9 = vector.broadcast %cst_8 : f32 to vector<128x32xf32>
    %10 = arith.maximumf %8, %9 : vector<128x32xf32>
    %11 = arith.truncf %10 : vector<128x32xf32> to vector<128x32xbf16>
    %c0_9 = arith.constant 0 : index
    %c0_10 = arith.constant 0 : index
    %12 = vector.load %arg6[%c0_9, %c0_10] : memref<32x32xbf16, #tpu.memory_space<vmem>>, vector<32x32xbf16>
    %cst_11 = arith.constant dense<0.000000e+00> : vector<128x32xf32>
    %13 = tpu.matmul %11, %12, %cst_11 {dimension_numbers = #tpu.dot_dimension_numbers<[1], [0], [0], [1], [0, 0, 1, 1], [], []>} : vector<128x32xbf16>, vector<32x32xbf16>, vector<128x32xf32> -> vector<128x32xf32>
    %14 = arith.truncf %13 : vector<128x32xf32> to vector<128x32xbf16>
    %cst_12 = arith.constant dense<0.000000e+00> : vector<128x32xf32>
    %15 = tpu.matmul %1, %14, %cst_12 {dimension_numbers = #tpu.dot_dimension_numbers<[1], [0], [0], [1], [0, 0, 1, 1], [], []>} : vector<128x128xbf16>, vector<128x32xbf16>, vector<128x32xf32> -> vector<128x32xf32>
    %c0_13 = arith.constant 0 : index
    %c0_14 = arith.constant 0 : index
    %16 = vector.load %arg7[%c0_13, %c0_14] : memref<1x32xf32, #tpu.memory_space<vmem>>, vector<1x32xf32>
    %17 = vector.broadcast %16 : vector<1x32xf32> to vector<128x32xf32>
    %18 = arith.addf %15, %17 : vector<128x32xf32>
    %cst_15 = arith.constant 0.000000e+00 : f32
    %19 = vector.broadcast %cst_15 : f32 to vector<128x32xf32>
    %20 = arith.maximumf %18, %19 : vector<128x32xf32>
    %21 = arith.truncf %20 : vector<128x32xf32> to vector<128x32xbf16>
    %c0_16 = arith.constant 0 : index
    %c0_17 = arith.constant 0 : index
    %22 = vector.load %arg8[%c0_16, %c0_17] : memref<32x32xbf16, #tpu.memory_space<vmem>>, vector<32x32xbf16>
    %cst_18 = arith.constant dense<0.000000e+00> : vector<128x32xf32>
    %23 = tpu.matmul %21, %22, %cst_18 {dimension_numbers = #tpu.dot_dimension_numbers<[1], [0], [0], [1], [0, 0, 1, 1], [], []>} : vector<128x32xbf16>, vector<32x32xbf16>, vector<128x32xf32> -> vector<128x32xf32>
    %24 = arith.truncf %23 : vector<128x32xf32> to vector<128x32xbf16>
    %cst_19 = arith.constant dense<0.000000e+00> : vector<128x32xf32>
    %25 = tpu.matmul %1, %24, %cst_19 {dimension_numbers = #tpu.dot_dimension_numbers<[1], [0], [0], [1], [0, 0, 1, 1], [], []>} : vector<128x128xbf16>, vector<128x32xbf16>, vector<128x32xf32> -> vector<128x32xf32>
    %c0_20 = arith.constant 0 : index
    %c0_21 = arith.constant 0 : index
    %26 = vector.load %arg9[%c0_20, %c0_21] : memref<1x32xf32, #tpu.memory_space<vmem>>, vector<1x32xf32>
    %27 = vector.broadcast %26 : vector<1x32xf32> to vector<128x32xf32>
    %28 = arith.addf %25, %27 : vector<128x32xf32>
    %c0_22 = arith.constant 0 : index
    %c0_23 = arith.constant 0 : index
    %29 = vector.load %arg3[%c0_22, %c0_23] : memref<8x128xf32, #tpu.memory_space<vmem>>, vector<8x128xf32>
    %cst_24 = arith.constant dense<0.000000e+00> : vector<8x32xf32>
    %30 = tpu.matmul %29, %28, %cst_24 {dimension_numbers = #tpu.dot_dimension_numbers<[1], [0], [0], [1], [0, 0, 1, 1], [], []>} : vector<8x128xf32>, vector<128x32xf32>, vector<8x32xf32> -> vector<8x32xf32>
    %c0_25 = arith.constant 0 : index
    %c0_26 = arith.constant 0 : index
    %31 = vector.load %arg10[%c0_25, %c0_26] : memref<8x32xf32, #tpu.memory_space<vmem>>, vector<8x32xf32>
    tpu.vector_store %arg10[%c0_25, %c0_26], %30 {strides = array<i32>} : memref<8x32xf32, #tpu.memory_space<vmem>>, vector<8x32xf32>,
    return
  }
  func.func @transform_0(%arg0: i32) -> (i32, i32) {
    %c0_i32 = arith.constant 0 : i32
    %c0_i32_0 = arith.constant 0 : i32
    return %arg0, %c0_i32 : i32, i32
  }
  func.func @transform_1(%arg0: i32) -> (i32, i32) {
    %c0_i32 = arith.constant 0 : i32
    %c0_i32_0 = arith.constant 0 : i32
    return %arg0, %c0_i32 : i32, i32
  }
  func.func @transform_2(%arg0: i32) -> (i32, i32) {
    %c0_i32 = arith.constant 0 : i32
    %c0_i32_0 = arith.constant 0 : i32
    return %arg0, %c0_i32 : i32, i32
  }
  func.func @transform_3(%arg0: i32) -> (i32, i32) {
    %c0_i32 = arith.constant 0 : i32
    %c0_i32_0 = arith.constant 0 : i32
    %c0_i32_1 = arith.constant 0 : i32
    return %c0_i32, %c0_i32_0 : i32, i32
  }
  func.func @transform_4(%arg0: i32) -> (i32, i32) {
    %c0_i32 = arith.constant 0 : i32
    %c0_i32_0 = arith.constant 0 : i32
    %c0_i32_1 = arith.constant 0 : i32
    return %c0_i32, %c0_i32_0 : i32, i32
  }
  func.func @transform_5(%arg0: i32) -> (i32, i32) {
    %c0_i32 = arith.constant 0 : i32
    %c0_i32_0 = arith.constant 0 : i32
    %c0_i32_1 = arith.constant 0 : i32
    return %c0_i32, %c0_i32_0 : i32, i32
  }
  func.func @transform_6(%arg0: i32) -> (i32, i32) {
    %c0_i32 = arith.constant 0 : i32
    %c0_i32_0 = arith.constant 0 : i32
    %c0_i32_1 = arith.constant 0 : i32
    return %c0_i32, %c0_i32_0 : i32, i32
  }
  func.func @transform_7(%arg0: i32) -> (i32, i32) {
    %c0_i32 = arith.constant 0 : i32
    %c0_i32_0 = arith.constant 0 : i32
    %c0_i32_1 = arith.constant 0 : i32
    return %c0_i32, %c0_i32_0 : i32, i32
  }
  func.func @transform_8(%arg0: i32) -> (i32, i32) {
    %c0_i32 = arith.constant 0 : i32
    %c0_i32_0 = arith.constant 0 : i32
    %c0_i32_1 = arith.constant 0 : i32
    return %c0_i32, %c0_i32_0 : i32, i32
  }
  func.func @transform_9(%arg0: i32) -> (i32, i32) {
    %c0_i32 = arith.constant 0 : i32
    %c0_i32_0 = arith.constant 0 : i32
    return %arg0, %c0_i32 : i32, i32
  }
}

</mosaic_0001>

<bundles_post_ra>
// kernel: tpu_custom_call.1
= control target key start
LH: loop header
LB: loop body
LE: loop exit
PB: predicated region body
PF: predicated region fallthrough
CT: control target
= control target key end

     0   :  { %s2452_s0 = inlined_call_operand.vmem [shape: bf16[256,8], index: 0, kind: input, shape index: {}]   ;;  %s2453_s1 = inlined_call_operand.vmem [shape: bf16[256,128], index: 1, kind: input, shape index: {}]   ;;  %s2454_s2 = inlined_call_operand.hbm [shape: f32[16,128], index: 2, kind: input, shape index: {}]   ;;  %s2455_s3 = inlined_call_operand.hbm [shape: bf16[8,32], index: 3, kind: input, shape index: {}]   ;;  %s2456_s4 = inlined_call_operand.vmem [shape: f32[1,32], index: 4, kind: input, shape index: {}]   ;;  %s2457_s5 = inlined_call_operand.vmem [shape: bf16[32,32], index: 5, kind: input, shape index: {}]   ;;  %s2458_s6 = inlined_call_operand.vmem [shape: f32[1,32], index: 6, kind: input, shape index: {}]   ;;  %s2459_s7 = inlined_call_operand.vmem [shape: bf16[32,32], index: 7, kind: input, shape index: {}]   ;;  %s2460_s8 = inlined_call_operand.vmem [shape: f32[1,32], index: 8, kind: input, shape index: {}]   ;;  %s2461_s9 = inlined_call_operand.hbm [shape: f32[16,32], index: 9, kind: output, shape index: {}]  }
   0x1   :  { %2465 = sst [smem:[#allocation11_spill]] %s2455_s3 }
   0x2   :  { %14 = vsyncpa [#allocation3], 0 }
   0x3   :  { %16 = vsyncpa [#allocation3 + $0x1], 0 }
   0x4   :  { %17 = vsyncpa [#allocation6], 0 }
   0x5   :  { %18 = vsyncpa [#allocation4], 0 }
   0x6   :  { %20 = vsyncpa [#allocation4 + $0x1], 0  ;;  %s2141_s30 = smov 0   ;;  %s2143_s10 = smov 0  }
   0x7   :  { %s2145_s11 = smov 0   ;;  %s2147_s12 = smov 0  }
   0x8 LB: > { %s2162_s13 = sadd.s32 4294967295, %s2083_s12   ;;  %s1502_s14 = sadd.s32 4294967294, %s2083_s12   ;;  %s2083_s12 = sphi %s2147_s12, %s2487_s12   ;;  %s2079_s11 = sphi %s2145_s11, %s2486_s11   ;;  %s2075_s10 = sphi %s2143_s10, %s2485_s10   ;;  %s2071_s30 = sphi %s2141_s30, %s2484_s30  }
   0x9   : > { %p98_p0 = scmp.ne.s32.totalorder %s2075_s10, %s2071_s30  ;;  %p2462_p1 = scmp.eq.s32.totalorder %s2162_s13, 0 }
   0xa   : > { %p254_p3 = scmp.eq.s32.totalorder %s1502_s14, 1  ;;  %p1503_p5 = scmp.ge.s32.totalorder %s2083_s12, 1 }
   0xb   : > { %p2171_p4 = por %p2462_p1, %p98_p0  ;;  %p261_p7 = scmp.lt.s32.totalorder %s2083_s12, 3 }
   0xc   : > { %p2176_p6 = por %p254_p3, %p98_p0  ;;  %s2085_s18 = smov [#allocation5]  }
   0xd   : > { %s2466_s15 = scalar_select %p2171_p4, 1, 0 }
   0xe   : > { %s2467_s16 = scalar_select %p2176_p6, 1, 0 }
   0xf   : > { %p2181_p8 = pnand %p1503_p5, %p261_p7  ;;  %s274_s19 = sshll.u32 %s2085_s18, 4  ;;  %s275_s19 = int_to_ptr.vmem [resolvable:$true] %s274_s19 }
  0x10   : > { %s2189_s20 = sadd.s32 1, %s2083_s12   ;;  %s85_s24 = sadd.s32 1, %s2079_s11 }
  0x11   : > { %s2468_s17 = scalar_select %p2181_p8, 1, 0 }
  0x12   : > { %p1883_p10 = pneg %p2181_p8  ;;  %s82_s22 = ssub.s32 %s2083_s12, %s2189_s20 }
  0x13   : > { %p2199_p12 = scmp.eq.s32.totalorder %s82_s22, 0  ;;  %s2471_s3 = sld [smem:[#allocation11_spill]] }
  0x14   : > { %p2193_p11 = pnand %p1883_p10, %p2462_p1 }
  0x15   : > { %s2470_s23 = scalar_select %p2199_p12, 1, 0 }
  0x16   : > { %p1957_p3 = pneg %p2193_p11 }
  0x19   : > { %s1955_s27 = scalar_lea.hbm %s2471_s3, 64 }
  0x1a   : > { %p1956_p0 = scmp.ne.s32.totalorder %s2471_s3, %s1955_s27  ;;  %p1962_p10 = scmp.lt.u32.totalorder %s1955_s27, %s2471_s3 }
  0x1c   : > { %p1958_p5 = pnand %p1957_p3, %p1956_p0 }
  0x1e   : > { %p1959_p7 = pneg %p1958_p5 }
  0x20   : > { %p1964_p9 = pnand %p1962_p10, %p1959_p7 }
  0x22   : > { %1967 = shalt.err (!%p1964_p9)
}
  0x23   : > { %s1968_s22 = scalar_lea.vmem %s275_s19, 64  ;;  %p1976_p6 = scmp.lt.s32.totalorder %s275_s19, %s275_s19 }
  0x24   : > { %p1969_p1 = scmp.ne.s32.totalorder %s275_s19, %s1968_s22  ;;  %p1977_p4 = scmp.lt.s32.totalorder %s1968_s22, %s1968_s22 }
  0x26   : > { %p1971_p2 = pnand %p1969_p1, %p1957_p3  ;;  %p1978_p8 = por %p1977_p4, %p1976_p6 }
  0x28   : > { %p1972_p13 = pneg %p1971_p2 }
  0x2a   : > { %p1979_p12 = pnand %p1978_p8, %p1972_p13 }
  0x2c   : > { %1982 = shalt.err (!%p1979_p12)
}
  0x2d   : > { %1886 = dma.hbm_to_vmem [thread:$0]  (!%p2193_p11), %s2471_s3, 64, %s275_s19, [#allocation6]  }
  0x2e   : > { %p2472_p1 = scmp.ne.s32.totalorder %s2470_s23, 0  ;;  %p93_p2 = scmp.eq.s32.totalorder %s2083_s12, 0 }
  0x2f   : > { %p2473_p4 = scmp.ne.s32.totalorder %s2079_s11, %s2075_s10  ;;  %p2474_p6 = scmp.eq.s32.totalorder %s2162_s13, 1 }
  0x30   : > { %s2225_s27 = scalar_select %p2472_p1, %s2079_s11, %s85_s24  }
  0x31   : > { %p2233_p8 = por %p2474_p6, %p2473_p4  ;;  %p1896_p9 = scmp.lt.s32.totalorder %s2083_s12, 2 }
  0x32   : > { %s318_s28 = sand.u32 1, %s2079_s11   ;;  %p2476_p12 = pmov %p2473_p4 }
  0x33   : > { %s1506_s29 = sshll.u32 %s318_s28, 3  ;;  %s1507_s14 = sshll.u32 %s2083_s12, 7 }
  0x34   : > { %p94_p13 = por %p93_p2, %p2476_p12  ;;  %s2246_s19 = scalar_lea.hbm %s2454_s2, %s1507_s14 }
  0x35   : > { %s322_s23 = scalar_lea.vmem [#allocation2], %s1506_s29  ;;  %s319_s26 = scalar_lea.sflag [#allocation3], %s318_s28 }
  0x36   : > { %s329_s24 = sshll.u32 %s322_s23, 4  ;;  %p2248_p11 = pnand %p1896_p9, %p94_p13  ;;  %s2252_s24 = int_to_ptr.vmem [resolvable:$true] %s329_s24 }
  0x37   : > { %s1983_s3 = scalar_lea.hbm %s2246_s19, 128  ;;  %s1988_s18 = scalar_lea.hbm %s2454_s2, 256 }
  0x38   : > { %p1984_p0 = scmp.ne.s32.totalorder %s2246_s19, %s1983_s3  ;;  %p1985_p3 = pneg %p2248_p11 }
  0x39   : > { %p1989_p10 = scmp.lt.u32.totalorder %s2246_s19, %s2454_s2  ;;  %p1990_p1 = scmp.lt.u32.totalorder %s1988_s18, %s1983_s3 }
  0x3a   : > { %p1986_p5 = pnand %p1985_p3, %p1984_p0  ;;  %p1992_p4 = scmp.lt.u32.totalorder %s1983_s3, %s2246_s19 }
  0x3b   : > { %p1991_p2 = por %p1990_p1, %p1989_p10 }
  0x3c   : > { %p1987_p7 = pneg %p1986_p5 }
  0x3d   : > { %p1993_p6 = por %p1992_p4, %p1991_p2 }
  0x3f   : > { %p1994_p9 = pnand %p1993_p6, %p1987_p7 }
  0x41   : > { %1997 = shalt.err (!%p1994_p9)
}
  0x42   : > { %s1998_s28 = scalar_lea.vmem %s2252_s24, 128  ;;  %s2086_s14 = smov [#allocation2]  }
  0x43   : > { %p1999_p12 = scmp.ne.s32.totalorder %s2252_s24, %s1998_s28  ;;  %s2003_s29 = sshll.u32 %s2086_s14, 4  ;;  %s2004_s29 = int_to_ptr.vmem [resolvable:$false] %s2003_s29 }
  0x44   : > { %s2005_s22 = scalar_lea.vmem %s2004_s29, 256  ;;  %p2006_p5 = scmp.lt.s32.totalorder %s2252_s24, %s2004_s29 }
  0x45   : > { %p2001_p13 = pnand %p1999_p12, %p1985_p3  ;;  %p2007_p10 = scmp.lt.s32.totalorder %s2005_s22, %s1998_s28 }
  0x47   : > { %p2002_p0 = pneg %p2001_p13  ;;  %p2008_p1 = por %p2007_p10, %p2006_p5 }
  0x49   : > { %p2009_p2 = pnand %p2008_p1, %p2002_p0 }
  0x4b   : > { %2012 = shalt.err (!%p2009_p2)
}
  0x4c   : > { %1890 = dma.hbm_to_vmem [thread:$0]  (!%p2248_p11), %s2246_s19, 128, %s2252_s24, %s319_s26  }
  0x4d   : > { %p2478_p7 = scmp.ne.s32.totalorder %s2468_s17, 0 }
  0x4e   : > { %s2282_s3 = sand.u32 (!%p2478_p7), 1, %s2075_s10   ;;  %p2479_p3 = scmp.ne.s32.totalorder (!%p2478_p7), %s2466_s15, 0 }
  0x4f   : > { %338 = sbr.rel (%p2478_p7) target bundleno = 1765 (0x6e5), region = 56  ;;  %s1509_s18 = sshll.u32 (!%p2478_p7), %s2282_s3, 3 }
  0x50   : > { %s341_s23 = scalar_lea.sflag (!%p2478_p7), [#allocation3], %s2282_s3  ;;  %s2288_s28 = scalar_lea.vmem (!%p2478_p7), [#allocation2], %s1509_s18 }
  0x56   : > { %2058 = dma.done.wait (%p2479_p3), %s341_s23, 128  }
  0x57   : > { %2060 = vsyncadd (%p2479_p3), %s341_s23, 4294967168  ;;  %p2480_p11 = scmp.eq.s32.totalorder %s2162_s13, 0 }
  0x59   : > { %2062 = dma.done.wait (%p2480_p11), [#allocation6], 64   ;;  %p2481_p4 = pmov %p2480_p11 }
  0x5a   : > { %s1512_s17 = sshll.u32 %s2162_s13, 4  ;;  %vm504_vm0 = vcmask 1043456   ;;  %vm479_vm1 = vcmask 64512   ;;  %v438_v0 = vld [vmem:[#allocation5] sm:$0xf]  ;;  %v1951_v11 = vld [vmem:[%s2457_s5] sm:$0xff]  }
  0x5b   : > { %2064 = vsyncadd (%p2481_p4), [#allocation6], 4294967232  ;;  %p394_p6 = scmp.lt.s32.totalorder %s1512_s17, 31  ;;  %1874 = vmatprep.subr.msk.bf16.mxu0 %vm504_vm0, %v438_v0  ;;  %v506_v1 = vsel %vm504_vm0, %v438_v0, 0  ;;  %v1952_v12 = vld [vmem:[%s2457_s5 + $0x8] sm:$0xff]   ;;  %vm805_vm2 = vcmask 261120  }
  0x5c   : > { %1662 = vmatpush3.bf16.msra.mxu0 %v506_v1  ;;  %v1532_v44 = vld [vmem:[%s2456_s4] ss:$0 sm:$0xff]  ;;  %vm2088_vm3 = vmmov 0   ;;  %s1564_s24 = sshll.u32 %s2162_s13, 7  ;;  %s392_s25 = scalar_lea.vmem [#allocation7], %s1509_s18 }
  0x5d   : > { %s2489_s17 = smov (!%p394_p6, %s1512_s17), 31  ;;  %1711 = vmatprep.subr.bf16.mxu0 %v1951_v11  ;;  %s2090_s13 = smov [#allocation7]  }
  0x5e   : > { %s1513_s19 = sshll.u32 %s2489_s17, 2  ;;  %s2017_s18 = sshll.u32 %s2090_s13, 4  ;;  %s2018_s18 = int_to_ptr.vmem [resolvable:$false] %s2017_s18 }
  0x5f   : > { %s397_s26 = scalar_lea.vmem %s2452_s0, %s1513_s19  ;;  %s2308_s29 = scalar_lea.vmem %s2453_s1, %s1513_s19 }
  0x60   : > { %v1935_v2 = vld [vmem:[%s397_s26] sm:$0xff]   ;;  %v1936_v3 = vld [vmem:[%s397_s26 + $0x8] sm:$0xff]   ;;  %v1937_v4 = vld [vmem:[%s397_s26 + $0x10] sm:$0xff]   ;;  %s2019_s23 = scalar_lea.vmem %s2018_s18, 256 }
  0x61   : > { %1663 = vmatprep.mubr.msk.bf16.mxu0 %vm479_vm1, %v1935_v2  ;;  %v1938_v5 = vld [vmem:[%s397_s26 + $0x18] sm:$0xff]   ;;  %v1939_v6 = vld [vmem:[%s397_s26 + $0x20] sm:$0xff]   ;;  %v1940_v7 = vld [vmem:[%s397_s26 + $0x28] sm:$0xff]  }
  0x62   : > { %1664 = vmatmul.mubr.msk.bf16.vlgmr.msra.gmra.mrb[0].mxu0 %vm479_vm1, %v1936_v3  ;;  %v1941_v8 = vld [vmem:[%s397_s26 + $0x30] sm:$0xff]   ;;  %v1942_v9 = vld [vmem:[%s397_s26 + $0x38] sm:$0xff]   ;;  %v2316_v10 = vld [vmem:[%s2308_s29] sm:$0xff]   ;;  %s1398_s26 = sshll.u32 %s392_s25, 4  ;;  %s2409_s26 = int_to_ptr.vmem [resolvable:$true] %s1398_s26 }
  0x63   : > { %1667 = vmatprep.mubr.msk.bf16.mxu0 %vm479_vm1, %v1937_v4  ;;  %1695 = vmatprep.mubr.bf16.mxu1 %v2316_v10  ;;  %v2326_v37 = vld [vmem:[%s2308_s29 + $0x8] sm:$0xff]   ;;  %v2329_v38 = vld [vmem:[%s2308_s29 + $0x10] sm:$0xff]   ;;  %v2334_v39 = vld [vmem:[%s2308_s29 + $0x18] sm:$0xff]   ;;  %s2013_s22 = scalar_lea.vmem %s2409_s26, 128  ;;  %p2020_p0 = scmp.lt.s32.totalorder %s2409_s26, %s2018_s18 }
  0x64   : > { %1712 = vmatpush3.bf16.msra.mxu0 %v1951_v11  ;;  %v2337_v40 = vld [vmem:[%s2308_s29 + $0x20] sm:$0xff]   ;;  %v2342_v41 = vld [vmem:[%s2308_s29 + $0x28] sm:$0xff]   ;;  %v2345_v42 = vld [vmem:[%s2308_s29 + $0x30] sm:$0xff]   ;;  %p2014_p9 = scmp.ne.s32.totalorder %s2409_s26, %s2013_s22  ;;  %p2021_p5 = scmp.lt.s32.totalorder %s2019_s23, %s2013_s22 }
  0x65   : > { %1713 = vmatprep.subr.bf16.mxu0 %v1952_v12  ;;  %v2350_v43 = vld [vmem:[%s2308_s29 + $0x38] sm:$0xff]   ;;  %s2407_s29 = scalar_lea.hbm %s2461_s9, %s1564_s24 }
  0x66   : > { %p2015_p12 = pnand %p2014_p9, %p2233_p8  ;;  %p2022_p10 = por %p2021_p5, %p2020_p0 }
  0x68   : > { %1714 = vmatpush3.bf16.msra.mxu0 %v1952_v12  ;;  %p2016_p13 = pneg %p2015_p12 }
  0x6a   : > { %1668 = vmatmul.mubr.msk.bf16.gmra.mrb[4].mxu0 %vm479_vm1, %v1938_v5  ;;  %p2023_p1 = pnand %p2022_p10, %p2016_p13 }
  0x6b   : > { %1671 = vmatprep.mubr.msk.bf16.mxu0 %vm479_vm1, %v1939_v6 }
  0x72   : > { %1672 = vmatmul.mubr.msk.bf16.gmra.mrb[8].mxu0 %vm479_vm1, %v1940_v7 }
  0x73   : > { %1675 = vmatprep.mubr.msk.bf16.mxu0 %vm479_vm1, %v1941_v8 }
  0x7a   : > { %1676 = vmatmul.mubr.msk.bf16.gmra.mrb[12].mxu0 %vm479_vm1, %v1942_v9 }
 0x135   : > { %v1665_v13 = vpop.f32.mrb[0].mxu0 }
 0x136   : > { %v542_v14 = vpop.f32.mrb[1].mxu0 }
 0x137   : > { %v1666_v15 = vpop.f32.mrb[2].mxu0 }
 0x138   : > { %v606_v16 = vpack.c.bf16 %v1666_v15, %v1665_v13  ;;  %v545_v17 = vpop.f32.mrb[3].mxu0 }
 0x139   : > { %v605_v18 = vpack.c.bf16 %v545_v17, %v542_v14 }
 0x13b   : > { %1679 = vmatprep.subr.bf16.mxu1 %v605_v18 }
 0x13c   : > { %1680 = vmatpush3.bf16.msra.mxu1 %v605_v18 }
 0x13d   : > { %v1669_v19 = vpop.f32.mrb[4].mxu0  ;;  %1681 = vmatprep.subr.bf16.mxu1 %v606_v16 }
 0x13e   : > { %v558_v20 = vpop.f32.mrb[5].mxu0 }
 0x13f   : > { %v1670_v21 = vpop.f32.mrb[6].mxu0 }
 0x140   : > { %v608_v22 = vpack.c.bf16 %v1670_v21, %v1669_v19  ;;  %v561_v23 = vpop.f32.mrb[7].mxu0  ;;  %1682 = vmatpush3.bf16.msra.mxu1 %v606_v16 }
 0x141   : > { %v607_v24 = vpack.c.bf16 %v561_v23, %v558_v20 }
 0x143   : > { %1683 = vmatprep.subr.bf16.mxu1 %v607_v24 }
 0x144   : > { %1684 = vmatpush3.bf16.msra.mxu1 %v607_v24 }
 0x145   : > { %v1673_v25 = vpop.f32.mrb[8].mxu0  ;;  %1685 = vmatprep.subr.bf16.mxu1 %v608_v22 }
 0x146   : > { %v574_v26 = vpop.f32.mrb[9].mxu0 }
 0x147   : > { %v1674_v27 = vpop.f32.mrb[10].mxu0 }
 0x148   : > { %v610_v28 = vpack.c.bf16 %v1674_v27, %v1673_v25  ;;  %v577_v29 = vpop.f32.mrb[11].mxu0  ;;  %1686 = vmatpush3.bf16.msra.mxu1 %v608_v22 }
 0x149   : > { %v609_v30 = vpack.c.bf16 %v577_v29, %v574_v26 }
 0x14b   : > { %1687 = vmatprep.subr.bf16.mxu1 %v609_v30 }
 0x14c   : > { %1688 = vmatpush3.bf16.msra.mxu1 %v609_v30 }
 0x14d   : > { %v1677_v31 = vpop.f32.mrb[12].mxu0  ;;  %1689 = vmatprep.subr.bf16.mxu1 %v610_v28 }
 0x14e   : > { %v590_v32 = vpop.f32.mrb[13].mxu0 }
 0x14f   : > { %v1678_v33 = vpop.f32.mrb[14].mxu0 }
 0x150   : > { %v612_v34 = vpack.c.bf16 %v1678_v33, %v1677_v31  ;;  %v593_v35 = vpop.f32.mrb[15].mxu0  ;;  %1690 = vmatpush3.bf16.msra.mxu1 %v610_v28 }
 0x151   : > { %v611_v36 = vpack.c.bf16 %v593_v35, %v590_v32 }
 0x153   : > { %1691 = vmatprep.subr.bf16.mxu1 %v611_v36 }
 0x154   : > { %1692 = vmatpush3.bf16.msra.mxu1 %v611_v36 }
 0x155   : > { %1693 = vmatprep.subr.bf16.mxu1 %v612_v34 }
 0x158   : > { %1694 = vmatpush3.bf16.msra.mxu1 %v612_v34 }
 0x15b   : > { %1696 = vmatmul.mubr.bf16.vlgmr.msra.gmra.mrb[0].mxu1 %v2326_v37 }
 0x15c   : > { %1699 = vmatprep.mubr.bf16.mxu1 %v2329_v38 }
 0x163   : > { %1700 = vmatmul.mubr.bf16.gmra.mrb[4].mxu1 %v2334_v39 }
 0x164   : > { %1703 = vmatprep.mubr.bf16.mxu1 %v2337_v40 }
 0x16b   : > { %1704 = vmatmul.mubr.bf16.gmra.mrb[8].mxu1 %v2342_v41 }
 0x16c   : > { %1707 = vmatprep.mubr.bf16.mxu1 %v2345_v42 }
 0x173   : > { %1708 = vmatmul.mubr.bf16.gmra.mrb[12].mxu1 %v2350_v43 }
 0x174   : > { %1747 = vmatprep.mubr.bf16.mxu1 %v2316_v10 }
 0x22e   : > { %v1697_v45 = vpop.f32.mrb[0].mxu1 }
 0x22f   : > { %v711_v46 = vadd.f32 %v1697_v45, %v1532_v44  ;;  %v702_v47 = vpop.f32.mrb[1].mxu1 }
 0x230   : > { %v703_v48 = vadd.f32 %v1532_v44, %v702_v47  ;;  %v1698_v49 = vpop.f32.mrb[2].mxu1  ;;  %v1954_v47 = vld [vmem:[%s2459_s7 + $0x8] sm:$0xff]  }
 0x231   : > { %v714_v50 = vadd.f32 %v1698_v49, %v1532_v44  ;;  %v705_v51 = vpop.f32.mrb[3].mxu1  ;;  %v767_v53 = vmax.f32 %v711_v46, 0.0  ;;  %v1953_v46 = vld [vmem:[%s2459_s7] sm:$0xff]  }
 0x232   : > { %v706_v52 = vadd.f32 %v1532_v44, %v705_v51  ;;  %v765_v55 = vmax.f32 %v703_v48, 0.0  ;;  %1763 = vmatprep.subr.bf16.mxu0 %v1953_v46 }
 0x233   : > { %v768_v54 = vmax.f32 %v714_v50, 0.0 }
 0x234   : > { %v766_v56 = vmax.f32 %v706_v52, 0.0 }
 0x235   : > { %v782_v57 = vpack.c.bf16 %v768_v54, %v767_v53 }
 0x236   : > { %v781_v58 = vpack.c.bf16 %v766_v56, %v765_v55  ;;  %v1701_v59 = vpop.f32.mrb[4].mxu1 }
 0x237   : > { %v727_v60 = vadd.f32 %v1701_v59, %v1532_v44  ;;  %v718_v61 = vpop.f32.mrb[5].mxu1 }
 0x238   : > { %v719_v62 = vadd.f32 %v1532_v44, %v718_v61  ;;  %v1702_v63 = vpop.f32.mrb[6].mxu1  ;;  %1715 = vmatprep.mubr.msk.bf16.mxu0 %vm805_vm2, %v781_v58 }
 0x239   : > { %v730_v0 = vadd.f32 %v1702_v63, %v1532_v44  ;;  %v721_v1 = vpop.f32.mrb[7].mxu1  ;;  %1716 = vmatmul.mubr.msk.bf16.vlgmr.msra.gmra.mrb[16].mxu0 %vm805_vm2, %v782_v57  ;;  %v771_v3 = vmax.f32 %v727_v60, 0.0 }
 0x23a   : > { %v722_v2 = vadd.f32 %v1532_v44, %v721_v1  ;;  %v769_v5 = vmax.f32 %v719_v62, 0.0  ;;  %1764 = vmatpush3.bf16.msra.mxu0 %v1953_v46 }
 0x23b   : > { %v772_v4 = vmax.f32 %v730_v0, 0.0  ;;  %1765 = vmatprep.subr.bf16.mxu0 %v1954_v47 }
 0x23c   : > { %v770_v6 = vmax.f32 %v722_v2, 0.0 }
 0x23d   : > { %v784_v7 = vpack.c.bf16 %v772_v4, %v771_v3 }
 0x23e   : > { %v783_v8 = vpack.c.bf16 %v770_v6, %v769_v5  ;;  %v1705_v9 = vpop.f32.mrb[8].mxu1  ;;  %1766 = vmatpush3.bf16.msra.mxu0 %v1954_v47 }
 0x23f   : > { %v743_v11 = vadd.f32 %v1705_v9, %v1532_v44  ;;  %v734_v12 = vpop.f32.mrb[9].mxu1 }
 0x240   : > { %v735_v13 = vadd.f32 %v1532_v44, %v734_v12  ;;  %v1706_v14 = vpop.f32.mrb[10].mxu1  ;;  %1719 = vmatprep.mubr.msk.bf16.mxu0 %vm805_vm2, %v783_v8 }
 0x241   : > { %v746_v15 = vadd.f32 %v1706_v14, %v1532_v44  ;;  %v737_v16 = vpop.f32.mrb[11].mxu1  ;;  %1720 = vmatmul.mubr.msk.bf16.gmra.mrb[20].mxu0 %vm805_vm2, %v784_v7  ;;  %v775_v18 = vmax.f32 %v743_v11, 0.0  ;;  %v1551_v7 = vld [vmem:[%s2458_s6] ss:$0 sm:$0xff] }
 0x242   : > { %v738_v17 = vadd.f32 %v1532_v44, %v737_v16  ;;  %v773_v20 = vmax.f32 %v735_v13, 0.0 }
 0x243   : > { %v776_v19 = vmax.f32 %v746_v15, 0.0 }
 0x244   : > { %v774_v21 = vmax.f32 %v738_v17, 0.0 }
 0x245   : > { %v786_v22 = vpack.c.bf16 %v776_v19, %v775_v18 }
 0x246   : > { %v785_v23 = vpack.c.bf16 %v774_v21, %v773_v20  ;;  %v1709_v24 = vpop.f32.mrb[12].mxu1 }
 0x247   : > { %v759_v25 = vadd.f32 %v1709_v24, %v1532_v44  ;;  %v750_v26 = vpop.f32.mrb[13].mxu1 }
 0x248   : > { %v751_v27 = vadd.f32 %v1532_v44, %v750_v26  ;;  %v1710_v28 = vpop.f32.mrb[14].mxu1  ;;  %1723 = vmatprep.mubr.msk.bf16.mxu0 %vm805_vm2, %v785_v23 }
 0x249   : > { %v762_v29 = vadd.f32 %v1710_v28, %v1532_v44  ;;  %v753_v30 = vpop.f32.mrb[15].mxu1  ;;  %1724 = vmatmul.mubr.msk.bf16.gmra.mrb[24].mxu0 %vm805_vm2, %v786_v22  ;;  %v779_v32 = vmax.f32 %v759_v25, 0.0 }
 0x24a   : > { %v754_v31 = vadd.f32 %v1532_v44, %v753_v30  ;;  %v777_v34 = vmax.f32 %v751_v27, 0.0 }
 0x24b   : > { %v780_v33 = vmax.f32 %v762_v29, 0.0 }
 0x24c   : > { %v778_v35 = vmax.f32 %v754_v31, 0.0 }
 0x24d   : > { %v788_v36 = vpack.c.bf16 %v780_v33, %v779_v32 }
 0x24e   : > { %v787_v45 = vpack.c.bf16 %v778_v35, %v777_v34 }
 0x250   : > { %1727 = vmatprep.mubr.msk.bf16.mxu0 %vm805_vm2, %v787_v45 }
 0x251   : > { %1728 = vmatmul.mubr.msk.bf16.gmra.mrb[28].mxu0 %vm805_vm2, %v788_v36 }
 0x30c   : > { %v1717_v44 = vpop.f32.mrb[16].mxu0 }
 0x30d   : > { %v864_v48 = vpop.f32.mrb[17].mxu0 }
 0x30e   : > { %v1718_v49 = vpop.f32.mrb[18].mxu0 }
 0x30f   : > { %v928_v50 = vpack.c.bf16 %v1718_v49, %v1717_v44  ;;  %v867_v51 = vpop.f32.mrb[19].mxu0 }
 0x310   : > { %v927_v52 = vpack.c.bf16 %v867_v51, %v864_v48 }
 0x312   : > { %1731 = vmatprep.subr.bf16.mxu1 %v927_v52 }
 0x313   : > { %1732 = vmatpush3.bf16.msra.mxu1 %v927_v52 }
 0x314   : > { %v1721_v53 = vpop.f32.mrb[20].mxu0  ;;  %1733 = vmatprep.subr.bf16.mxu1 %v928_v50 }
 0x315   : > { %v880_v54 = vpop.f32.mrb[21].mxu0 }
 0x316   : > { %v1722_v55 = vpop.f32.mrb[22].mxu0 }
 0x317   : > { %v930_v56 = vpack.c.bf16 %v1722_v55, %v1721_v53  ;;  %v883_v57 = vpop.f32.mrb[23].mxu0  ;;  %1734 = vmatpush3.bf16.msra.mxu1 %v928_v50 }
 0x318   : > { %v929_v58 = vpack.c.bf16 %v883_v57, %v880_v54 }
 0x31a   : > { %1735 = vmatprep.subr.bf16.mxu1 %v929_v58 }
 0x31b   : > { %1736 = vmatpush3.bf16.msra.mxu1 %v929_v58 }
 0x31c   : > { %v1725_v59 = vpop.f32.mrb[24].mxu0  ;;  %1737 = vmatprep.subr.bf16.mxu1 %v930_v56 }
 0x31d   : > { %v896_v60 = vpop.f32.mrb[25].mxu0 }
 0x31e   : > { %v1726_v61 = vpop.f32.mrb[26].mxu0 }
 0x31f   : > { %v932_v62 = vpack.c.bf16 %v1726_v61, %v1725_v59  ;;  %v899_v63 = vpop.f32.mrb[27].mxu0  ;;  %1738 = vmatpush3.bf16.msra.mxu1 %v930_v56 }
 0x320   : > { %v931_v0 = vpack.c.bf16 %v899_v63, %v896_v60 }
 0x322   : > { %1739 = vmatprep.subr.bf16.mxu1 %v931_v0 }
 0x323   : > { %1740 = vmatpush3.bf16.msra.mxu1 %v931_v0 }
 0x324   : > { %v1729_v1 = vpop.f32.mrb[28].mxu0  ;;  %1741 = vmatprep.subr.bf16.mxu1 %v932_v62 }
 0x325   : > { %v912_v2 = vpop.f32.mrb[29].mxu0 }
 0x326   : > { %v1730_v3 = vpop.f32.mrb[30].mxu0 }
 0x327   : > { %v934_v4 = vpack.c.bf16 %v1730_v3, %v1729_v1  ;;  %v915_v5 = vpop.f32.mrb[31].mxu0  ;;  %1742 = vmatpush3.bf16.msra.mxu1 %v932_v62 }
 0x328   : > { %v933_v6 = vpack.c.bf16 %v915_v5, %v912_v2 }
 0x32a   : > { %1743 = vmatprep.subr.bf16.mxu1 %v933_v6 }
 0x32b   : > { %1744 = vmatpush3.bf16.msra.mxu1 %v933_v6 }
 0x32c   : > { %1745 = vmatprep.subr.bf16.mxu1 %v934_v4 }
 0x32f   : > { %1746 = vmatpush3.bf16.msra.mxu1 %v934_v4 }
 0x332   : > { %1748 = vmatmul.mubr.bf16.vlgmr.msra.gmra.mrb[16].mxu1 %v2326_v37 }
 0x333   : > { %1751 = vmatprep.mubr.bf16.mxu1 %v2329_v38 }
 0x33a   : > { %1752 = vmatmul.mubr.bf16.gmra.mrb[20].mxu1 %v2334_v39 }
 0x33b   : > { %1755 = vmatprep.mubr.bf16.mxu1 %v2337_v40 }
 0x342   : > { %1756 = vmatmul.mubr.bf16.gmra.mrb[24].mxu1 %v2342_v41 }
 0x343   : > { %1759 = vmatprep.mubr.bf16.mxu1 %v2345_v42 }
 0x34a   : > { %1760 = vmatmul.mubr.bf16.gmra.mrb[28].mxu1 %v2350_v43 }
 0x34b   : > { %1799 = vmatprep.mubr.bf16.mxu1 %v2316_v10 }
 0x405   : > { %v1749_v8 = vpop.f32.mrb[16].mxu1 }
 0x406   : > { %v985_v9 = vadd.f32 %v1749_v8, %v1551_v7  ;;  %v976_v11 = vpop.f32.mrb[17].mxu1 }
 0x407   : > { %v977_v12 = vadd.f32 %v1551_v7, %v976_v11  ;;  %v1750_v13 = vpop.f32.mrb[18].mxu1 }
 0x408   : > { %v988_v14 = vadd.f32 %v1750_v13, %v1551_v7  ;;  %v979_v15 = vpop.f32.mrb[19].mxu1  ;;  %v1041_v17 = vmax.f32 %v985_v9, 0.0 }
 0x409   : > { %v980_v16 = vadd.f32 %v1551_v7, %v979_v15  ;;  %v1039_v19 = vmax.f32 %v977_v12, 0.0 }
 0x40a   : > { %v1042_v18 = vmax.f32 %v988_v14, 0.0 }
 0x40b   : > { %v1040_v20 = vmax.f32 %v980_v16, 0.0 }
 0x40c   : > { %v1056_v21 = vpack.c.bf16 %v1042_v18, %v1041_v17 }
 0x40d   : > { %v1055_v22 = vpack.c.bf16 %v1040_v20, %v1039_v19  ;;  %v1753_v23 = vpop.f32.mrb[20].mxu1 }
 0x40e   : > { %v1001_v10 = vadd.f32 %v1753_v23, %v1551_v7  ;;  %v992_v24 = vpop.f32.mrb[21].mxu1 }
 0x40f   : > { %v993_v25 = vadd.f32 %v1551_v7, %v992_v24  ;;  %v1754_v26 = vpop.f32.mrb[22].mxu1  ;;  %1767 = vmatprep.mubr.msk.bf16.mxu0 %vm805_vm2, %v1055_v22 }
 0x410   : > { %v1004_v27 = vadd.f32 %v1754_v26, %v1551_v7  ;;  %v995_v28 = vpop.f32.mrb[23].mxu1  ;;  %1768 = vmatmul.mubr.msk.bf16.vlgmr.msra.gmra.mrb[32].mxu0 %vm805_vm2, %v1056_v21  ;;  %v1045_v30 = vmax.f32 %v1001_v10, 0.0 }
 0x411   : > { %v996_v29 = vadd.f32 %v1551_v7, %v995_v28  ;;  %v1043_v32 = vmax.f32 %v993_v25, 0.0 }
 0x412   : > { %v1046_v31 = vmax.f32 %v1004_v27, 0.0 }
 0x413   : > { %v1044_v33 = vmax.f32 %v996_v29, 0.0 }
 0x414   : > { %v1058_v34 = vpack.c.bf16 %v1046_v31, %v1045_v30  ;;  %v2087_v31 = vmov 0.0|0.0  }
 0x415   : > { %v1057_v35 = vpack.c.bf16 %v1044_v33, %v1043_v32  ;;  %v1757_v36 = vpop.f32.mrb[24].mxu1  ;;  %1850 = vmatprep.subr.bf16.mxu0 %v2087_v31  ;;  %v2089_v32 = vmov 0.0  }
 0x416   : > { %v1017_v45 = vadd.f32 %v1757_v36, %v1551_v7  ;;  %v1008_v46 = vpop.f32.mrb[25].mxu1 }
 0x417   : > { %v1009_v47 = vadd.f32 %v1551_v7, %v1008_v46  ;;  %v1758_v44 = vpop.f32.mrb[26].mxu1  ;;  %1771 = vmatprep.mubr.msk.bf16.mxu0 %vm805_vm2, %v1057_v35 }
 0x418   : > { %v1020_v48 = vadd.f32 %v1758_v44, %v1551_v7  ;;  %v1011_v49 = vpop.f32.mrb[27].mxu1  ;;  %1772 = vmatmul.mubr.msk.bf16.gmra.mrb[36].mxu0 %vm805_vm2, %v1058_v34  ;;  %v1049_v51 = vmax.f32 %v1017_v45, 0.0 }
 0x419   : > { %v1012_v50 = vadd.f32 %v1551_v7, %v1011_v49  ;;  %v1047_v53 = vmax.f32 %v1009_v47, 0.0 }
 0x41a   : > { %v1050_v52 = vmax.f32 %v1020_v48, 0.0 }
 0x41b   : > { %v1048_v54 = vmax.f32 %v1012_v50, 0.0 }
 0x41c   : > { %v1060_v55 = vpack.c.bf16 %v1050_v52, %v1049_v51 }
 0x41d   : > { %v1059_v56 = vpack.c.bf16 %v1048_v54, %v1047_v53  ;;  %v1761_v57 = vpop.f32.mrb[28].mxu1 }
 0x41e   : > { %v1033_v58 = vadd.f32 %v1761_v57, %v1551_v7  ;;  %v1024_v59 = vpop.f32.mrb[29].mxu1 }
 0x41f   : > { %v1025_v60 = vadd.f32 %v1551_v7, %v1024_v59  ;;  %v1762_v61 = vpop.f32.mrb[30].mxu1  ;;  %1775 = vmatprep.mubr.msk.bf16.mxu0 %vm805_vm2, %v1059_v56 }
 0x420   : > { %v1036_v62 = vadd.f32 %v1762_v61, %v1551_v7  ;;  %v1027_v63 = vpop.f32.mrb[31].mxu1  ;;  %1776 = vmatmul.mubr.msk.bf16.gmra.mrb[40].mxu0 %vm805_vm2, %v1060_v55  ;;  %v1053_v1 = vmax.f32 %v1033_v58, 0.0 }
 0x421   : > { %v1028_v0 = vadd.f32 %v1551_v7, %v1027_v63  ;;  %v1051_v3 = vmax.f32 %v1025_v60, 0.0 }
 0x422   : > { %v1054_v2 = vmax.f32 %v1036_v62, 0.0 }
 0x423   : > { %v1052_v4 = vmax.f32 %v1028_v0, 0.0 }
 0x424   : > { %v1062_v5 = vpack.c.bf16 %v1054_v2, %v1053_v1 }
 0x425   : > { %v1061_v6 = vpack.c.bf16 %v1052_v4, %v1051_v3 }
 0x427   : > { %1779 = vmatprep.mubr.msk.bf16.mxu0 %vm805_vm2, %v1061_v6 }
 0x428   : > { %1780 = vmatmul.mubr.msk.bf16.gmra.mrb[44].mxu0 %vm805_vm2, %v1062_v5 }
 0x429   : > { %1847 = vmatprep.mubr.msk.f32.mxu0 %vm2088_vm3, %v2089_v32 }
 0x4e3   : > { %v1769_v8 = vpop.f32.mrb[32].mxu0 }
 0x4e4   : > { %v1137_v9 = vpop.f32.mrb[33].mxu0 }
 0x4e5   : > { %v1770_v11 = vpop.f32.mrb[34].mxu0 }
 0x4e6   : > { %v1201_v12 = vpack.c.bf16 %v1770_v11, %v1769_v8  ;;  %v1140_v13 = vpop.f32.mrb[35].mxu0 }
 0x4e7   : > { %v1200_v14 = vpack.c.bf16 %v1140_v13, %v1137_v9 }
 0x4e9   : > { %1783 = vmatprep.subr.bf16.mxu1 %v1200_v14 }
 0x4ea   : > { %1784 = vmatpush3.bf16.msra.mxu1 %v1200_v14 }
 0x4eb   : > { %v1773_v15 = vpop.f32.mrb[36].mxu0  ;;  %1785 = vmatprep.subr.bf16.mxu1 %v1201_v12 }
 0x4ec   : > { %v1153_v7 = vpop.f32.mrb[37].mxu0 }
 0x4ed   : > { %v1774_v16 = vpop.f32.mrb[38].mxu0 }
 0x4ee   : > { %v1203_v17 = vpack.c.bf16 %v1774_v16, %v1773_v15  ;;  %v1156_v18 = vpop.f32.mrb[39].mxu0  ;;  %1786 = vmatpush3.bf16.msra.mxu1 %v1201_v12  ;;  %v1312_v12 = vld [vmem:[%s2288_s28] sm:$0xff]  ;;  %s1385_s28 = scalar_lea.sflag [#allocation4], %s2282_s3 }
 0x4ef   : > { %v1202_v19 = vpack.c.bf16 %v1156_v18, %v1153_v7 }
 0x4f1   : > { %1787 = vmatprep.subr.bf16.mxu1 %v1202_v19 }
 0x4f2   : > { %1788 = vmatpush3.bf16.msra.mxu1 %v1202_v19 }
 0x4f3   : > { %v1777_v20 = vpop.f32.mrb[40].mxu0  ;;  %1789 = vmatprep.subr.bf16.mxu1 %v1203_v17 }
 0x4f4   : > { %v1169_v21 = vpop.f32.mrb[41].mxu0 }
 0x4f5   : > { %v1778_v22 = vpop.f32.mrb[42].mxu0 }
 0x4f6   : > { %v1205_v23 = vpack.c.bf16 %v1778_v22, %v1777_v20  ;;  %v1172_v10 = vpop.f32.mrb[43].mxu0  ;;  %1790 = vmatpush3.bf16.msra.mxu1 %v1203_v17 }
 0x4f7   : > { %v1204_v24 = vpack.c.bf16 %v1172_v10, %v1169_v21 }
 0x4f9   : > { %1791 = vmatprep.subr.bf16.mxu1 %v1204_v24 }
 0x4fa   : > { %1792 = vmatpush3.bf16.msra.mxu1 %v1204_v24 }
 0x4fb   : > { %v1781_v25 = vpop.f32.mrb[44].mxu0  ;;  %1793 = vmatprep.subr.bf16.mxu1 %v1205_v23 }
 0x4fc   : > { %v1185_v26 = vpop.f32.mrb[45].mxu0 }
 0x4fd   : > { %v1782_v27 = vpop.f32.mrb[46].mxu0 }
 0x4fe   : > { %v1207_v28 = vpack.c.bf16 %v1782_v27, %v1781_v25  ;;  %v1188_v29 = vpop.f32.mrb[47].mxu0  ;;  %1794 = vmatpush3.bf16.msra.mxu1 %v1205_v23 }
 0x4ff   : > { %v1206_v30 = vpack.c.bf16 %v1188_v29, %v1185_v26 }
 0x501   : > { %1795 = vmatprep.subr.bf16.mxu1 %v1206_v30 }
 0x502   : > { %1796 = vmatpush3.bf16.msra.mxu1 %v1206_v30 }
 0x503   : > { %1797 = vmatprep.subr.bf16.mxu1 %v1207_v28 }
 0x506   : > { %1798 = vmatpush3.bf16.msra.mxu1 %v1207_v28 }
 0x509   : > { %1800 = vmatmul.mubr.bf16.vlgmr.msra.gmra.mrb[32].mxu1 %v2326_v37  ;;  %v1562_v37 = vld [vmem:[%s2460_s8] ss:$0 sm:$0xff] }
 0x50a   : > { %1803 = vmatprep.mubr.bf16.mxu1 %v2329_v38 }
 0x511   : > { %1804 = vmatmul.mubr.bf16.gmra.mrb[36].mxu1 %v2334_v39 }
 0x512   : > { %1807 = vmatprep.mubr.bf16.mxu1 %v2337_v40 }
 0x519   : > { %1808 = vmatmul.mubr.bf16.gmra.mrb[40].mxu1 %v2342_v41 }
 0x51a   : > { %1811 = vmatprep.mubr.bf16.mxu1 %v2345_v42 }
 0x521   : > { %1812 = vmatmul.mubr.bf16.gmra.mrb[44].mxu1 %v2350_v43 }
 0x5dc   : > { %v1801_v33 = vpop.f32.mrb[32].mxu1 }
 0x5dd   : > { %v1249_v38 = vpop.f32.mrb[33].mxu1  ;;  %v1258_v34 = vadd.f32 %v1801_v33, %v1562_v37 }
 0x5de   : > { %v1802_v39 = vpop.f32.mrb[34].mxu1  ;;  %v1250_v41 = vadd.f32 %v1562_v37, %v1249_v38 }
 0x5df   : > { %v1261_v40 = vadd.f32 %v1802_v39, %v1562_v37  ;;  %v1252_v35 = vpop.f32.mrb[35].mxu1 }
 0x5e0   : > { %v1253_v36 = vadd.f32 %v1562_v37, %v1252_v35 }
 0x5e1   : > { %v1854_v42 = vpack.c.bf16 %v1261_v40, %v1258_v34 }
 0x5e2   : > { %v1851_v45 = vpack.c.bf16 %v1253_v36, %v1250_v41 }
 0x5e4   : > { %v1805_v43 = vpop.f32.mrb[36].mxu1  ;;  %1852 = vmatpush3.bf16.msra.mxu0 %v1851_v45 }
 0x5e5   : > { %v1265_v46 = vpop.f32.mrb[37].mxu1  ;;  %1853 = vmatprep.subr.bf16.mxu0 %v2087_v31  ;;  %v1274_v44 = vadd.f32 %v1805_v43, %v1562_v37 }
 0x5e6   : > { %v1806_v47 = vpop.f32.mrb[38].mxu1  ;;  %v1266_v50 = vadd.f32 %v1562_v37, %v1265_v46 }
 0x5e7   : > { %v1277_v48 = vadd.f32 %v1806_v47, %v1562_v37  ;;  %v1268_v49 = vpop.f32.mrb[39].mxu1 }
 0x5e8   : > { %v1269_v51 = vadd.f32 %v1562_v37, %v1268_v49  ;;  %1855 = vmatpush3.bf16.msra.mxu0 %v1854_v42 }
 0x5e9   : > { %v1860_v52 = vpack.c.bf16 %v1277_v48, %v1274_v44  ;;  %1856 = vmatprep.subr.bf16.mxu0 %v2087_v31 }
 0x5ea   : > { %v1857_v53 = vpack.c.bf16 %v1269_v51, %v1266_v50 }
 0x5ec   : > { %v1809_v54 = vpop.f32.mrb[40].mxu1  ;;  %1858 = vmatpush3.bf16.msra.mxu0 %v1857_v53 }
 0x5ed   : > { %v1281_v55 = vpop.f32.mrb[41].mxu1  ;;  %1859 = vmatprep.subr.bf16.mxu0 %v2087_v31  ;;  %v1290_v57 = vadd.f32 %v1809_v54, %v1562_v37 }
 0x5ee   : > { %v1810_v56 = vpop.f32.mrb[42].mxu1  ;;  %v1282_v60 = vadd.f32 %v1562_v37, %v1281_v55 }
 0x5ef   : > { %v1293_v58 = vadd.f32 %v1810_v56, %v1562_v37  ;;  %v1284_v59 = vpop.f32.mrb[43].mxu1 }
 0x5f0   : > { %v1285_v61 = vadd.f32 %v1562_v37, %v1284_v59  ;;  %1861 = vmatpush3.bf16.msra.mxu0 %v1860_v52 }
 0x5f1   : > { %v1866_v62 = vpack.c.bf16 %v1293_v58, %v1290_v57  ;;  %1862 = vmatprep.subr.bf16.mxu0 %v2087_v31 }
 0x5f2   : > { %v1863_v63 = vpack.c.bf16 %v1285_v61, %v1282_v60 }
 0x5f4   : > { %v1813_v0 = vpop.f32.mrb[44].mxu1  ;;  %1864 = vmatpush3.bf16.msra.mxu0 %v1863_v63 }
 0x5f5   : > { %v1297_v1 = vpop.f32.mrb[45].mxu1  ;;  %1865 = vmatprep.subr.bf16.mxu0 %v2087_v31  ;;  %v1306_v3 = vadd.f32 %v1813_v0, %v1562_v37 }
 0x5f6   : > { %v1814_v2 = vpop.f32.mrb[46].mxu1  ;;  %v1298_v6 = vadd.f32 %v1562_v37, %v1297_v1 }
 0x5f7   : > { %v1309_v4 = vadd.f32 %v1814_v2, %v1562_v37  ;;  %v1300_v5 = vpop.f32.mrb[47].mxu1 }
 0x5f8   : > { %v1301_v8 = vadd.f32 %v1562_v37, %v1300_v5  ;;  %1867 = vmatpush3.bf16.msra.mxu0 %v1866_v62 }
 0x5f9   : > { %v1872_v9 = vpack.c.bf16 %v1309_v4, %v1306_v3  ;;  %1868 = vmatprep.subr.bf16.mxu0 %v2087_v31 }
 0x5fa   : > { %v1869_v11 = vpack.c.bf16 %v1301_v8, %v1298_v6 }
 0x5fc   : > { %1870 = vmatpush3.bf16.msra.mxu0 %v1869_v11 }
 0x5fd   : > { %1871 = vmatprep.subr.bf16.mxu0 %v2087_v31 }
 0x600   : > { %1873 = vmatpush3.bf16.msra.mxu0 %v1872_v9 }
 0x603   : > { %1848 = vmatmul.mubr.f32.vlgmr.msra.gmra.mrb[48].mxu0 %v1312_v12 }
 0x6d6   : > { %v1379_v13 = vpop.f32.mrb[48].mxu0 }
 0x6d7   : > { %1383 = vst.msk [vmem:[%s392_s25] sm:$0xff] %vm805_vm2, %v1379_v13  ;;  %v1849_v14 = vpop.f32.mrb[49].mxu0 }
 0x6d8   : > { %2026 = shalt.err (!%p2023_p1)
}
 0x6d9   : > { %s2027_s3 = scalar_lea.hbm %s2407_s29, 128  ;;  %s2031_s24 = scalar_lea.hbm %s2461_s9, 256 }
 0x6da   : > { %p2028_p2 = scmp.ne.s32.totalorder %s2407_s29, %s2027_s3  ;;  %p2032_p11 = scmp.lt.u32.totalorder %s2407_s29, %s2461_s9 }
 0x6db   : > { %p2033_p4 = scmp.lt.u32.totalorder %s2031_s24, %s2027_s3  ;;  %p2035_p9 = scmp.lt.u32.totalorder %s2027_s3, %s2407_s29 }
 0x6dc   : > { %p2029_p7 = pnand %p2028_p2, %p2233_p8 }
 0x6dd   : > { %p2034_p6 = por %p2033_p4, %p2032_p11 }
 0x6de   : > { %p2030_p3 = pneg %p2029_p7 }
 0x6df   : > { %p2036_p12 = por %p2035_p9, %p2034_p6 }
 0x6e1   : > { %p2037_p13 = pnand %p2036_p12, %p2030_p3 }
 0x6e3   : > { %2040 = shalt.err (!%p2037_p13)
}
 0x6e4   : > { %1881 = dma.vmem_to_hbm [thread:$0]  (%p2233_p8), %s2409_s26, 128, %s2407_s29, %s1385_s28  }
 0x6e5 PF: > { %s1410_s14 = sand.u32 1, %s2071_s30   ;;  %p2482_p0 = scmp.ne.s32.totalorder %s2467_s16, 0 }
 0x6e6   : > { %p2483_p5 = scmp.ge.s32.totalorder %s2083_s12, 2  ;;  %s1411_s22 = scalar_lea.sflag [#allocation4], %s1410_s14 }
 0x6e8   : > { %p1892_p10 = pnand %p2483_p5, %p2482_p0 }
 0x6ea   : > { %2066 = dma.done.wait (!%p1892_p10), %s1411_s22, 128  }
 0x6eb   : > { %2068 = vsyncadd (!%p1892_p10), %s1411_s22, 4294967168  ;;  %p23_p1 = scmp.ge.s32.totalorder %s2189_s20, 4   ;;  %s2484_s30 = smov %s2075_s10 }
 0x6ec   : > { %s2485_s10 = smov %s2079_s11  ;;  %s2486_s11 = smov %s2225_s27 }
 0x6ed   : > { %s2487_s12 = smov %s2189_s20  ;;  %25 = sbr.rel (!%p23_p1) target bundleno = 8 (0x8), region = 111 }
 0x6f4   :  { %1416 = vsyncpa [#allocation3], 1 }
 0x6f5   :  { %1418 = vsyncpa [#allocation3 + $0x1], 1 }
 0x6f6   :  { %1419 = vsyncpa [#allocation6], 1 }
 0x6f7   :  { %1420 = vsyncpa [#allocation4], 1 }
 0x6f8   :  { %1422 = vsyncpa [#allocation4 + $0x1], 1 }

</bundles_post_ra>
